<compile_context>
chip_gen: v6e
topology: v6e:2x2x1
jax: 0.10.0
libtpu: 0.0.40
codegen_flags: <defaults>
</compile_context>

<pallas_src>
import numpy as np
import jax
import jax.numpy as jnp
from jax.experimental import pallas as pl
from jax.experimental.pallas import tpu as pltpu

_LANE = 128
# Lane-dense candidate widths (widest first): wider last dim => fewer, bigger
# DMA descriptors and unmasked wide stores (biggest measured lever for a
# mem-bound copy).
_LANE_WIDTH_CANDIDATES = (16384, 8192, 4096, 2048, 1024, 512, 256, 128)
# ~8 MiB per block.  Double-buffered input + output => ~32 MiB in flight,
# under the explicit 48 MiB scoped-VMEM limit below, which itself is under
# the smallest physical VMEM (v7x: 64 MiB per TC).
_TARGET_BLOCK_BYTES = 8 * 1024 * 1024
# Explicit scoped-VMEM budget; fixes v5e's 16 MiB default and stays under
# v7x's 64 MiB physical per-TC VMEM.
_VMEM_LIMIT_BYTES = 48 * 1024 * 1024
# Row granularity that keeps full packed vregs for every dtype
# (8 sublanes f32, 16 bf16, 32 int8/fp8).
_ROW_MULTIPLE = 32
# Ensure the grid has enough steps for megacore sharding (>=2 per TC on v7x)
# and for input/output DMA overlap within each core.
_MIN_GRID_STEPS = 4


def _copy_kernel(x_ref, o_ref):
    # Pure identity copy of the current (block_rows, lane_width) tile.
    o_ref[...] = x_ref[...]


def _pallas_flat_copy(x_2d):
    """Tiled identity copy of an (R, W) slab (W a multiple of 128)."""
    rows, lanes = x_2d.shape
    itemsize = jnp.dtype(x_2d.dtype).itemsize

    block_rows = max(1, _TARGET_BLOCK_BYTES // (lanes * itemsize))
    if block_rows >= rows:
        block_rows = rows
    else:
        # Keep a 32-row multiple so every supported dtype stays on full
        # packed (sublane, lane) tiles; pl.cdiv masks the partial edge block.
        block_rows = max(_ROW_MULTIPLE, (block_rows // _ROW_MULTIPLE) * _ROW_MULTIPLE)
        block_rows = min(block_rows, rows)

    # Guarantee >= _MIN_GRID_STEPS grid steps when rows permit, so v7x's two
    # TensorCores both get work and the pipeline still overlaps DMA with the
    # (nil) compute.  For small tensors this is a no-op.
    per_step_cap = (rows // _MIN_GRID_STEPS // _ROW_MULTIPLE) * _ROW_MULTIPLE
    if per_step_cap >= _ROW_MULTIPLE:
        block_rows = min(block_rows, per_step_cap)

    grid = (pl.cdiv(rows, block_rows),)
    bytes_accessed = 2 * rows * lanes * itemsize  # one read + one write pass

    return pl.pallas_call(
        _copy_kernel,
        out_shape=jax.ShapeDtypeStruct((rows, lanes), x_2d.dtype),
        grid_spec=pl.GridSpec(
            grid=grid,
            in_specs=[pl.BlockSpec((block_rows, lanes), lambda i: (i, 0))],
            out_specs=pl.BlockSpec((block_rows, lanes), lambda i: (i, 0)),
        ),
        compiler_params=pltpu.CompilerParams(
            dimension_semantics=("parallel",),  # shards across v7x's 2 TCs
            vmem_limit_bytes=_VMEM_LIMIT_BYTES,
        ),
        cost_estimate=pl.CostEstimate(
            flops=0, transcendentals=0, bytes_accessed=bytes_accessed
        ),
    )(x_2d)


def _resolve_shape(target_shape, numel):
    """Replicate torch.view's handling of a single -1 dimension."""
    shape = list(target_shape)
    if -1 in shape:
        idx = shape.index(-1)
        known = int(np.prod([s for j, s in enumerate(shape) if j != idx]))
        assert known != 0 and numel % known == 0, "invalid shape for view"
        shape[idx] = numel // known
    assert int(np.prod(shape)) == numel, "shape numel mismatch for view"
    return tuple(shape)


class ReshapePallas:
    """JAX/Pallas equivalent of the PyTorch Reshape(*args) module.

    materialize=False  -> metadata-only reshape (free; identical to torch.view
                          semantics for contiguous tensors).
    materialize=True   -> routes the data through the tuned Pallas copy kernel
                          so the output is a distinct buffer (used here to
                          exercise the kernel; numerically identical).
    """

    def __init__(self, *args, materialize=True):
        self.shape = args
        self.materialize = materialize

    def __call__(self, x):
        numel = int(np.prod(x.shape)) if x.ndim > 0 else 1
        out_shape = _resolve_shape(self.shape, numel)

        # Fast path: a contiguous row-major reshape is a bitcast; skip the
        # extra HBM read+write pass entirely unless a materialized copy was
        # explicitly requested.
        if not self.materialize or numel == 0:
            return jnp.reshape(x, out_shape)

        # Pick the widest lane dim (multiple of 128) that divides numel
        # exactly so the copy needs no pad/slice round-trip (each of those
        # would add a full extra HBM pass around a bandwidth-bound kernel).
        lane_width = None
        for w in _LANE_WIDTH_CANDIDATES:
            if numel % w == 0:
                lane_width = w
                break

        if lane_width is None:
            # numel not a multiple of 128: skip the copy kernel rather than
            # pay pad + slice HBM passes for an irregular size.  Note this
            # path does NOT produce a distinct buffer.
            return jnp.reshape(x, out_shape)

        x_2d = jnp.reshape(x, (numel // lane_width, lane_width))
        y_2d = _pallas_flat_copy(x_2d)

        # Final shape change: metadata only, same semantics as torch .view().
        return jnp.reshape(y_2d, out_shape)


if __name__ == "__main__":
    key = jax.random.PRNGKey(0)
    x = jax.random.normal(key, (2, 4, 16, 16), dtype=jnp.float32)

    # Reshape(2, -1): (2, 4, 16, 16) -> (2, 1024), exactly like x.view(2, -1).
    reshape_mod = ReshapePallas(2, -1)  # materialize=True -> runs the kernel
    y = jax.block_until_ready(reshape_mod(x))

    # Correctness check against plain-JAX view semantics.
    expected = jnp.reshape(x, (2, 1024))
    assert y.shape == (2, 1024), y.shape
    assert y.dtype == x.dtype
    np.testing.assert_allclose(np.asarray(y), np.asarray(expected), rtol=0, atol=0)

    # Also check the zero-cost metadata path gives identical results.
    y_meta = jax.block_until_ready(ReshapePallas(2, -1, materialize=False)(x))
    np.testing.assert_allclose(np.asarray(y_meta), np.asarray(expected), rtol=0, atol=0)

    print("KERNEL_OK")
</pallas_src>

<mosaic_0001>
module attributes {stable_mosaic.version = 11 : i64} {
  func.func @_copy_kernel(%arg0: i32, %arg1: memref<1x2048xf32, #tpu.memory_space<vmem>>, %arg2: memref<1x2048xf32, #tpu.memory_space<vmem>>) attributes {dimension_semantics = [#tpu.dimension_semantics<parallel>], iteration_bounds = array<i64: 1>, scalar_prefetch = 0 : i64, scratch_operands = 0 : i64, tpu.core_type = #tpu.core_type<tc>, window_params = [{transform_indices = @transform_0, window_bounds = array<i64: 1, 2048>}, {transform_indices = @transform_1, window_bounds = array<i64: 1, 2048>}]} {
    %c0 = arith.constant 0 : index
    %c0_0 = arith.constant 0 : index
    %0 = vector.load %arg1[%c0, %c0_0] : memref<1x2048xf32, #tpu.memory_space<vmem>>, vector<1x2048xf32>
    %c0_1 = arith.constant 0 : index
    %c0_2 = arith.constant 0 : index
    %1 = vector.load %arg2[%c0_1, %c0_2] : memref<1x2048xf32, #tpu.memory_space<vmem>>, vector<1x2048xf32>
    tpu.vector_store %arg2[%c0_1, %c0_2], %0 {strides = array<i32>} : memref<1x2048xf32, #tpu.memory_space<vmem>>, vector<1x2048xf32>,
    return
  }
  func.func @transform_0(%arg0: i32) -> (i32, i32) {
    %c0_i32 = arith.constant 0 : i32
    %c0_i32_0 = arith.constant 0 : i32
    return %arg0, %c0_i32 : i32, i32
  }
  func.func @transform_1(%arg0: i32) -> (i32, i32) {
    %c0_i32 = arith.constant 0 : i32
    %c0_i32_0 = arith.constant 0 : i32
    return %arg0, %c0_i32 : i32, i32
  }
}

</mosaic_0001>

<bundles_post_ra>
// kernel: tpu_custom_call.1
= control target key start
LH: loop header
LB: loop body
LE: loop exit
PB: predicated region body
PF: predicated region fallthrough
CT: control target
= control target key end

     0   :  { %6 = vsyncpa [#allocation3], 0  ;;  %s104_s0 = inlined_call_operand.hbm [shape: f32[1,2048], index: 0, kind: input, shape index: {}]   ;;  %s105_s1 = inlined_call_operand.hbm [shape: f32[1,2048], index: 1, kind: output, shape index: {}]  }
   0x1   :  { %7 = vsyncpa [#allocation4], 0  ;;  %s86_s6 = smov [#allocation2]  }
   0x2   :  { %s14_s7 = sshll.u32 %s86_s6, 4  ;;  %s15_s7 = int_to_ptr.vmem [resolvable:$true] %s14_s7 }
   0x3   :  { %s50_s8 = scalar_lea.vmem %s15_s7, 256  ;;  %p55_p1 = scmp.lt.s32.totalorder %s15_s7, %s15_s7 }
   0x4   :  { %p51_p0 = scmp.ne.s32.totalorder %s15_s7, %s50_s8  ;;  %p56_p2 = scmp.lt.s32.totalorder %s50_s8, %s50_s8 }
   0x6   :  { %p57_p3 = por %p56_p2, %p55_p1 }
   0x8   :  { %p58_p4 = pnand %p57_p3, %p51_p0 }
   0xa   :  { %61 = shalt.err (!%p58_p4)
}
   0xb   :  { %17 = dma.hbm_to_vmem [thread:$0]  %s104_s0, 256, %s15_s7, [#allocation3]  }
   0xc   :  { %82 = dma.done.wait [#allocation3], 256  }
   0xd   :  { %83 = vsyncadd [#allocation3], 4294967040  ;;  %s87_s11 = smov [#allocation5]   ;;  %v21_v0 = vld [vmem:[#allocation2] sm:$0xff]  ;;  %v22_v1 = vld [vmem:[#allocation2 + $0x8] sm:$0xff] }
   0xe   :  { %s31_s12 = sshll.u32 %s87_s11, 4  ;;  %23 = vst [vmem:[#allocation5] sm:$0xff] %v21_v0  ;;  %24 = vst [vmem:[#allocation5 + $0x8] sm:$0xff] %v22_v1  ;;  %s32_s12 = int_to_ptr.vmem [resolvable:$true] %s31_s12 }
   0xf   :  { %s62_s13 = scalar_lea.vmem %s32_s12, 256  ;;  %p67_p6 = scmp.lt.s32.totalorder %s32_s12, %s32_s12 }
  0x10   :  { %p63_p5 = scmp.ne.s32.totalorder %s32_s12, %s62_s13  ;;  %p68_p7 = scmp.lt.s32.totalorder %s62_s13, %s62_s13 }
  0x12   :  { %p69_p8 = por %p68_p7, %p67_p6 }
  0x14   :  { %p70_p9 = pnand %p69_p8, %p63_p5 }
  0x16   :  { %73 = shalt.err (!%p70_p9)
}
  0x17   :  { %34 = dma.vmem_to_hbm [thread:$0]  %s32_s12, 256, %s105_s1, [#allocation4]  }
  0x18   :  { %84 = dma.done.wait [#allocation4], 256  }
  0x19   :  { %85 = vsyncadd [#allocation4], 4294967040 }
  0x1a   :  { %38 = vsyncpa [#allocation3], 1 }
  0x1b   :  { %39 = vsyncpa [#allocation4], 1 }

</bundles_post_ra>
